<compile_context>
chip_gen: v6e
topology: v6e:2x2x1
jax: 0.10.0
libtpu: 0.0.40
codegen_flags: <defaults>
</compile_context>

<pallas_src>
import functools

import jax
import jax.numpy as jnp
from jax.experimental import pallas as pl
from jax.experimental.pallas import tpu as pltpu


def weights_layer_kernel(x_ref, w0_ref, b0_ref, w1_ref, b1_ref, o_ref, *, out_size):
    # Linear 0 + Tanh. MXU accumulates in f32; activations stay f32 (cheap on
    # all generations, required on v5e's non-bf16 VPU/EUP). hid is padded to a
    # multiple of 128, so h lives in full-lane vregs.
    h = jnp.dot(x_ref[...], w0_ref[...], preferred_element_type=jnp.float32)
    h = jnp.tanh(h + b0_ref[...].astype(jnp.float32))

    # Linear 1 + ReLU. Cast h to the weight dtype so bf16 weights take the
    # native bf16 MXU path (no-op for f32 weights).
    # TODO(synk): on v5e, benchmark without this cast for bf16 weights (the
    # f32->bf16 pack is extra VPU work there; the MXU accepts mixed precision).
    z = jnp.dot(h.astype(w1_ref.dtype), w1_ref[...],
                preferred_element_type=jnp.float32)
    z = jnp.maximum(z + b1_ref[...].astype(jnp.float32), 0.0)

    # Mask the zero-padded output lanes to a huge negative value so the padded
    # softmax lanes contribute ~exp(-inf)=0 to the denominator (exactness of
    # the real lanes is preserved).
    out_p = o_ref.shape[-1]
    if out_p > out_size:
        col = jax.lax.broadcasted_iota(jnp.int32, z.shape, dimension=1)
        z = jnp.where(col < out_size, z, jnp.float32(-1e30))

    # Numerically stable softmax over dim=1 (last axis here). Exact divide:
    # denom is only (tb, 1), so the cost is negligible and row sums are exact.
    z_max = jnp.max(z, axis=-1, keepdims=True)
    e = jnp.exp(z - z_max)
    denom = jnp.sum(e, axis=-1, keepdims=True)
    o_ref[...] = (e / denom).astype(o_ref.dtype)


def _round_up(n, m):
    return ((n + m - 1) // m) * m


def _tpu_topology():
    """(physical_vmem_bytes, tensorcores_per_chip) with safe fallbacks."""
    vmem_bytes = 128 << 20
    cores = 1
    try:
        vmem_bytes = int(pltpu.get_tpu_info().vmem_capacity_bytes)
    except Exception:
        pass
    try:
        kind = jax.devices()[0].device_kind.lower()
        if "v7" in kind:          # v7x: 2 TensorCores per chip, 64 MiB VMEM per TC
            cores = 2
    except Exception:
        pass
    return vmem_bytes, cores


def _pick_tb(batch, cores, tb_max):
    """Batch tile: collapse the grid on single-TC chips, keep >=cores steps on v7x."""
    if batch <= 8:
        return batch
    if cores <= 1:
        tb = min(batch, tb_max)               # grid=(1,) whenever batch <= tb_max
    else:
        tb = min(tb_max, -(-batch // cores))  # ceil(batch/cores) -> grid has >= cores steps
    tb = max(8, (tb // 8) * 8)
    return min(tb, batch)


def _block_spec(shape, index_map, buffer_count=None):
    if buffer_count is None:
        return pl.BlockSpec(shape, index_map)
    try:
        return pl.BlockSpec(shape, index_map, pipeline_mode=pl.Buffered(buffer_count))
    except Exception:
        return pl.BlockSpec(shape, index_map)


def weights_layer(x, w0, b0, w1, b1, *, tb_max=1024):
    """x: (B, F); w0: (F, F//2); b0: (1, F//2); w1: (F//2, out); b1: (1, out)."""
    B, F = x.shape
    hid = w0.shape[1]
    out_size = w1.shape[1]

    # --- lane-dense padding (numerically exact, see kernel mask for softmax) ---
    hid_p = _round_up(hid, 128)
    out_p = _round_up(out_size, 128)
    if hid_p != hid:
        w0 = jnp.pad(w0, ((0, 0), (0, hid_p - hid)))
        b0 = jnp.pad(b0, ((0, 0), (0, hid_p - hid)))
        w1 = jnp.pad(w1, ((0, hid_p - hid), (0, 0)))
    if out_p != out_size:
        w1 = jnp.pad(w1, ((0, 0), (0, out_p - out_size)))
        b1 = jnp.pad(b1, ((0, 0), (0, out_p - out_size)))

    vmem_cap, cores = _tpu_topology()
    tb = _pick_tb(B, cores, tb_max)
    num_steps = pl.cdiv(B, tb)
    grid = (num_steps,)

    # 3-deep buffering on the streamed tiles only pays off when the grid is long.
    buf = 3 if num_steps >= 3 else None
    nbuf = buf or 2

    itemsize = jnp.dtype(x.dtype).itemsize
    w_bytes = sum(int(a.size) * jnp.dtype(a.dtype).itemsize
                  for a in (w0, b0, w1, b1))
    # resident (padded) weights + multi-buffered x/out tiles + f32 intermediates,
    # generous headroom; capped at 80% of this generation's physical VMEM.
    vmem_need = (w_bytes
                 + nbuf * tb * F * itemsize
                 + nbuf * tb * out_p * itemsize
                 + 4 * tb * (hid_p + out_p) * 4)
    vmem_limit = int(min(max(2 * vmem_need, 16 << 20), int(0.80 * vmem_cap)))

    # Cost hint uses the padded shapes actually executed.
    cost = pl.CostEstimate(
        flops=2 * B * F * hid_p + 2 * B * hid_p * out_p,
        transcendentals=B * (hid_p + out_p),          # tanh + exp
        bytes_accessed=(B * F * itemsize + w_bytes + B * out_p * itemsize),
    )

    # TODO(synk): if weights_num grows so the padded W0 no longer fits resident
    # in VMEM (threshold halves on v7x: 64 MiB/TC, weights duplicated per TC),
    # add a K-reduction grid axis ("arbitrary") with an f32 accumulator scratch
    # and gate bias+tanh on the last K step.
    kernel = functools.partial(weights_layer_kernel, out_size=out_size)
    out = pl.pallas_call(
        kernel,
        out_shape=jax.ShapeDtypeStruct((B, out_p), x.dtype),
        grid=grid,
        in_specs=[
            _block_spec((tb, F), lambda i: (i, 0), buf),        # x: batch-tiled
            pl.BlockSpec((F, hid_p), lambda i: (0, 0)),         # W0: resident
            pl.BlockSpec((1, hid_p), lambda i: (0, 0)),         # b0: resident
            pl.BlockSpec((hid_p, out_p), lambda i: (0, 0)),     # W1: resident
            pl.BlockSpec((1, out_p), lambda i: (0, 0)),         # b1: resident
        ],
        out_specs=_block_spec((tb, out_p), lambda i: (i, 0), buf),
        compiler_params=pltpu.CompilerParams(
            dimension_semantics=("parallel",),   # megacore sharding on v7x
            vmem_limit_bytes=vmem_limit,
        ),
        cost_estimate=cost,
    )(x, w0, b0, w1, b1)

    # Drop the zero-probability padded lanes.
    return out[:, :out_size]


def init_params(key, weights_num, output_size, dtype=jnp.float32):
    """Deterministic PyTorch-style Linear init: U(-1/sqrt(fan_in), 1/sqrt(fan_in))."""
    hid = weights_num // 2
    k0, k1, k2, k3 = jax.random.split(key, 4)
    lim0 = 1.0 / jnp.sqrt(weights_num)
    lim1 = 1.0 / jnp.sqrt(hid)
    # Stored as (in, out) = transpose of nn.Linear.weight
    w0 = jax.random.uniform(k0, (weights_num, hid), dtype, -lim0, lim0)
    b0 = jax.random.uniform(k1, (1, hid), dtype, -lim0, lim0)
    w1 = jax.random.uniform(k2, (hid, output_size), dtype, -lim1, lim1)
    b1 = jax.random.uniform(k3, (1, output_size), dtype, -lim1, lim1)
    return w0, b0, w1, b1


if __name__ == "__main__":
    weights_num = 32   # input feature size
    output_size = 16   # softmax output size
    batch = 256        # exercises batch tiling; grid=(1,) on v5e/v6e, (2,) on v7x

    key = jax.random.PRNGKey(0)
    kx, kp = jax.random.split(key)
    x = jax.random.normal(kx, (batch, weights_num), jnp.float32)
    w0, b0, w1, b1 = init_params(kp, weights_num, output_size)

    out = weights_layer(x, w0, b0, w1, b1)
    out = jax.block_until_ready(out)

    # Pure-JAX reference (same forward as the PyTorch module).
    h_ref = jnp.tanh(x @ w0 + b0)
    z_ref = jnp.maximum(h_ref @ w1 + b1, 0.0)
    ref = jax.nn.softmax(z_ref, axis=1)

    assert out.shape == (batch, output_size)
    assert bool(jnp.allclose(jnp.sum(out, axis=1), 1.0, atol=1e-3))
    assert bool(jnp.allclose(out, ref, atol=2e-3))

    print("KERNEL_OK")
</pallas_src>

<mosaic_0001>
module attributes {stable_mosaic.version = 11 : i64} {
  func.func @weights_layer_kernel(%arg0: i32, %arg1: memref<256x32xf32, #tpu.memory_space<vmem>>, %arg2: memref<32x128xf32, #tpu.memory_space<vmem>>, %arg3: memref<1x128xf32, #tpu.memory_space<vmem>>, %arg4: memref<128x128xf32, #tpu.memory_space<vmem>>, %arg5: memref<1x128xf32, #tpu.memory_space<vmem>>, %arg6: memref<256x128xf32, #tpu.memory_space<vmem>>) attributes {dimension_semantics = [#tpu.dimension_semantics<parallel>], iteration_bounds = array<i64: 1>, scalar_prefetch = 0 : i64, scratch_operands = 0 : i64, tpu.core_type = #tpu.core_type<tc>, window_params = [{transform_indices = @transform_0, window_bounds = array<i64: 256, 32>}, {pipeline_mode = #tpu.pipeline_mode<synchronous>, transform_indices = @transform_1, window_bounds = array<i64: 32, 128>}, {pipeline_mode = #tpu.pipeline_mode<synchronous>, transform_indices = @transform_2, window_bounds = array<i64: 1, 128>}, {pipeline_mode = #tpu.pipeline_mode<synchronous>, transform_indices = @transform_3, window_bounds = array<i64: 128, 128>}, {pipeline_mode = #tpu.pipeline_mode<synchronous>, transform_indices = @transform_4, window_bounds = array<i64: 1, 128>}, {transform_indices = @transform_5, window_bounds = array<i64: 256, 128>}]} {
    %c0 = arith.constant 0 : index
    %c0_0 = arith.constant 0 : index
    %0 = vector.load %arg1[%c0, %c0_0] : memref<256x32xf32, #tpu.memory_space<vmem>>, vector<256x32xf32>
    %c0_1 = arith.constant 0 : index
    %c0_2 = arith.constant 0 : index
    %1 = vector.load %arg2[%c0_1, %c0_2] : memref<32x128xf32, #tpu.memory_space<vmem>>, vector<32x128xf32>
    %cst = arith.constant dense<0.000000e+00> : vector<256x128xf32>
    %2 = tpu.matmul %0, %1, %cst {dimension_numbers = #tpu.dot_dimension_numbers<[1], [0], [0], [1], [0, 0, 1, 1], [], []>} : vector<256x32xf32>, vector<32x128xf32>, vector<256x128xf32> -> vector<256x128xf32>
    %c0_3 = arith.constant 0 : index
    %c0_4 = arith.constant 0 : index
    %3 = vector.load %arg3[%c0_3, %c0_4] : memref<1x128xf32, #tpu.memory_space<vmem>>, vector<1x128xf32>
    %4 = vector.broadcast %3 : vector<1x128xf32> to vector<256x128xf32>
    %5 = arith.addf %2, %4 : vector<256x128xf32>
    %6 = math.tanh %5 : vector<256x128xf32>
    %c0_5 = arith.constant 0 : index
    %c0_6 = arith.constant 0 : index
    %7 = vector.load %arg4[%c0_5, %c0_6] : memref<128x128xf32, #tpu.memory_space<vmem>>, vector<128x128xf32>
    %cst_7 = arith.constant dense<0.000000e+00> : vector<256x128xf32>
    %8 = tpu.matmul %6, %7, %cst_7 {dimension_numbers = #tpu.dot_dimension_numbers<[1], [0], [0], [1], [0, 0, 1, 1], [], []>} : vector<256x128xf32>, vector<128x128xf32>, vector<256x128xf32> -> vector<256x128xf32>
    %c0_8 = arith.constant 0 : index
    %c0_9 = arith.constant 0 : index
    %9 = vector.load %arg5[%c0_8, %c0_9] : memref<1x128xf32, #tpu.memory_space<vmem>>, vector<1x128xf32>
    %10 = vector.broadcast %9 : vector<1x128xf32> to vector<256x128xf32>
    %11 = arith.addf %8, %10 : vector<256x128xf32>
    %cst_10 = arith.constant 0.000000e+00 : f32
    %12 = vector.broadcast %cst_10 : f32 to vector<256x128xf32>
    %13 = arith.maximumf %11, %12 : vector<256x128xf32>
    %14 = tpu.iota {dimensions = array<i32: 1>} : vector<256x128xi32>
    %c16_i32 = arith.constant 16 : i32
    %15 = vector.broadcast %c16_i32 : i32 to vector<256x128xi32>
    %16 = arith.cmpi slt, %14, %15 : vector<256x128xi32>
    %cst_11 = arith.constant -1.000000e+30 : f32
    %17 = vector.broadcast %cst_11 : f32 to vector<256x128xf32>
    %18 = arith.select %16, %13, %17 : vector<256x128xi1>, vector<256x128xf32>
    %cst_12 = arith.constant dense<0xFF800000> : vector<256xf32>
    %19 = vector.multi_reduction <maximumf>, %18, %cst_12 [1] : vector<256x128xf32> to vector<256xf32>
    %20 = vector.shape_cast %19 : vector<256xf32> to vector<256x1xf32>
    %21 = vector.broadcast %20 : vector<256x1xf32> to vector<256x128xf32>
    %22 = arith.subf %18, %21 : vector<256x128xf32>
    %23 = math.exp %22 : vector<256x128xf32>
    %cst_13 = arith.constant dense<0.000000e+00> : vector<256xf32>
    %24 = vector.multi_reduction <add>, %23, %cst_13 [1] : vector<256x128xf32> to vector<256xf32>
    %25 = vector.shape_cast %24 : vector<256xf32> to vector<256x1xf32>
    %26 = vector.broadcast %25 : vector<256x1xf32> to vector<256x128xf32>
    %27 = arith.divf %23, %26 : vector<256x128xf32>
    %c0_14 = arith.constant 0 : index
    %c0_15 = arith.constant 0 : index
    %28 = vector.load %arg6[%c0_14, %c0_15] : memref<256x128xf32, #tpu.memory_space<vmem>>, vector<256x128xf32>
    tpu.vector_store %arg6[%c0_14, %c0_15], %27 {strides = array<i32>} : memref<256x128xf32, #tpu.memory_space<vmem>>, vector<256x128xf32>,
    return
  }
  func.func @transform_0(%arg0: i32) -> (i32, i32) {
    %c0_i32 = arith.constant 0 : i32
    %c0_i32_0 = arith.constant 0 : i32
    return %arg0, %c0_i32 : i32, i32
  }
  func.func @transform_1(%arg0: i32) -> (i32, i32) {
    %c0_i32 = arith.constant 0 : i32
    %c0_i32_0 = arith.constant 0 : i32
    %c0_i32_1 = arith.constant 0 : i32
    return %c0_i32, %c0_i32_0 : i32, i32
  }
  func.func @transform_2(%arg0: i32) -> (i32, i32) {
    %c0_i32 = arith.constant 0 : i32
    %c0_i32_0 = arith.constant 0 : i32
    %c0_i32_1 = arith.constant 0 : i32
    return %c0_i32, %c0_i32_0 : i32, i32
  }
  func.func @transform_3(%arg0: i32) -> (i32, i32) {
    %c0_i32 = arith.constant 0 : i32
    %c0_i32_0 = arith.constant 0 : i32
    %c0_i32_1 = arith.constant 0 : i32
    return %c0_i32, %c0_i32_0 : i32, i32
  }
  func.func @transform_4(%arg0: i32) -> (i32, i32) {
    %c0_i32 = arith.constant 0 : i32
    %c0_i32_0 = arith.constant 0 : i32
    %c0_i32_1 = arith.constant 0 : i32
    return %c0_i32, %c0_i32_0 : i32, i32
  }
  func.func @transform_5(%arg0: i32) -> (i32, i32) {
    %c0_i32 = arith.constant 0 : i32
    %c0_i32_0 = arith.constant 0 : i32
    return %arg0, %c0_i32 : i32, i32
  }
}

</mosaic_0001>

<bundles_post_ra>
// kernel: tpu_custom_call.1
= control target key start
LH: loop header
LB: loop body
LE: loop exit
PB: predicated region body
PF: predicated region fallthrough
CT: control target
= control target key end

     0   :  { %vm64_vm0 = vcmask 261120   ;;  %s2193_s0 = inlined_call_operand.vmem [shape: f32[256,32], index: 0, kind: input, shape index: {}]   ;;  %s2194_s1 = inlined_call_operand.vmem [shape: f32[32,128], index: 1, kind: input, shape index: {}]   ;;  %s2195_s2 = inlined_call_operand.vmem [shape: f32[1,128], index: 2, kind: input, shape index: {}]   ;;  %s2196_s3 = inlined_call_operand.vmem [shape: f32[128,128], index: 3, kind: input, shape index: {}]   ;;  %s2197_s4 = inlined_call_operand.vmem [shape: f32[1,128], index: 4, kind: input, shape index: {}]   ;;  %s2198_s5 = inlined_call_operand.hbm [shape: f32[256,128], index: 5, kind: output, shape index: {}]  }
   0x1   :  { %v56_v0 = vld [vmem:[%s2194_s1 + $0x18] sm:$0xff]  ;;  %v55_v1 = vld [vmem:[%s2194_s1 + $0x10] sm:$0xff]  ;;  %v21_v2 = vld [vmem:[%s2193_s0] sm:$0xff] }
   0x2   :  { %1187 = vmatprep.subr.mxu0 %v56_v0  ;;  %v54_v3 = vld [vmem:[%s2194_s1 + $0x8] sm:$0xff]  ;;  %1195 = vmatprep.mubr.msk.f32.mxu0 %vm64_vm0, %v21_v2  ;;  %v53_v4 = vld [vmem:[%s2194_s1] sm:$0xff]  ;;  %v23_v6 = vld [vmem:[%s2193_s0 + $0x10] sm:$0xff] }
   0x3   :  { %1188 = vmatpush3.msra.mxu0 %v56_v0  ;;  %v22_v5 = vld [vmem:[%s2193_s0 + $0x8] sm:$0xff]  ;;  %v24_v7 = vld [vmem:[%s2193_s0 + $0x18] sm:$0xff]  ;;  %v25_v8 = vld [vmem:[%s2193_s0 + $0x20] sm:$0xff] }
   0x4   :  { %1189 = vmatprep.subr.mxu0 %v55_v1  ;;  %v433_v9 = vld [vmem:[%s2196_s3 + $0x78] sm:$0xff]  ;;  %v432_v10 = vld [vmem:[%s2196_s3 + $0x70] sm:$0xff]  ;;  %v26_v11 = vld [vmem:[%s2193_s0 + $0x28] sm:$0xff] }
   0x5   :  { %1190 = vmatpush3.msra.mxu0 %v55_v1  ;;  %v431_v12 = vld [vmem:[%s2196_s3 + $0x68] sm:$0xff]  ;;  %v27_v13 = vld [vmem:[%s2193_s0 + $0x30] sm:$0xff]  ;;  %1323 = vmatprep.subr.mxu1 %v433_v9  ;;  %v430_v14 = vld [vmem:[%s2196_s3 + $0x60] sm:$0xff] }
   0x6   :  { %1191 = vmatprep.subr.mxu0 %v54_v3  ;;  %1339 = vmatpush3.msra.mxu1 %v433_v9 }
   0x7   :  { %1192 = vmatpush3.msra.mxu0 %v54_v3 }
   0x8   :  { %1193 = vmatprep.subr.mxu0 %v53_v4 }
   0x9   :  { %1194 = vmatpush3.msra.mxu0 %v53_v4 }
   0xa   :  { %1196 = vmatmul.mubr.msk.f32.vlgmr.msra.gmra.mxu0 %vm64_vm0, %v22_v5  ;;  %1243 = vmatprep.subr.mxu0 %v433_v9 }
   0xb   :  { %1198 = vmatprep.mubr.msk.f32.mxu0 %vm64_vm0, %v23_v6  ;;  %1244 = vmatpush3.msra.mxu0 %v433_v9 }
   0xc   :  { %1245 = vmatprep.subr.mxu0 %v432_v10 }
   0xd   :  { %1246 = vmatpush3.msra.mxu0 %v432_v10 }
   0xe   :  { %1199 = vmatmul.mubr.msk.f32.gmra.mxu0 %vm64_vm0, %v24_v7 }
   0xf   :  { %1201 = vmatprep.mubr.msk.f32.mxu0 %vm64_vm0, %v25_v8 }
  0x10   :  { %10 = vsyncpa [#allocation3], 0  ;;  %1247 = vmatprep.subr.mxu0 %v431_v12  ;;  %v28_v15 = vld [vmem:[%s2193_s0 + $0x38] sm:$0xff]  ;;  %v29_v17 = vld [vmem:[%s2193_s0 + $0x40] sm:$0xff]  ;;  %1324 = vmatprep.subr.mxu1 %v432_v10 }
  0x11   :  { %1248 = vmatpush3.msra.mxu0 %v431_v12  ;;  %v429_v16 = vld [vmem:[%s2196_s3 + $0x58] sm:$0xff]  ;;  %v428_v18 = vld [vmem:[%s2196_s3 + $0x50] sm:$0xff]  ;;  %1340 = vmatpush3.msra.mxu1 %v432_v10  ;;  %v30_v19 = vld [vmem:[%s2193_s0 + $0x48] sm:$0xff] }
  0x12   :  { %1202 = vmatmul.mubr.msk.f32.gmra.mxu0 %vm64_vm0, %v26_v11  ;;  %1249 = vmatprep.subr.mxu0 %v430_v14  ;;  %v427_v20 = vld [vmem:[%s2196_s3 + $0x48] sm:$0xff]  ;;  %v31_v21 = vld [vmem:[%s2193_s0 + $0x50] sm:$0xff]  ;;  %v426_v22 = vld [vmem:[%s2196_s3 + $0x40] sm:$0xff] }
  0x13   :  { %1204 = vmatprep.mubr.msk.f32.mxu0 %vm64_vm0, %v27_v13  ;;  %1250 = vmatpush3.msra.mxu0 %v430_v14  ;;  %v32_v23 = vld [vmem:[%s2193_s0 + $0x58] sm:$0xff]  ;;  %v33_v25 = vld [vmem:[%s2193_s0 + $0x60] sm:$0xff]  ;;  %v424_v26 = vld [vmem:[%s2196_s3 + $0x30] sm:$0xff] }
  0x14   :  { %1251 = vmatprep.subr.mxu0 %v429_v16  ;;  %1325 = vmatprep.subr.mxu1 %v431_v12  ;;  %v425_v24 = vld [vmem:[%s2196_s3 + $0x38] sm:$0xff]  ;;  %v34_v27 = vld [vmem:[%s2193_s0 + $0x68] sm:$0xff]  ;;  %v35_v29 = vld [vmem:[%s2193_s0 + $0x70] sm:$0xff] }
  0x15   :  { %1252 = vmatpush3.msra.mxu0 %v429_v16  ;;  %1341 = vmatpush3.msra.mxu1 %v431_v12  ;;  %v423_v28 = vld [vmem:[%s2196_s3 + $0x28] sm:$0xff]  ;;  %v422_v30 = vld [vmem:[%s2196_s3 + $0x20] sm:$0xff]  ;;  %v36_v31 = vld [vmem:[%s2193_s0 + $0x78] sm:$0xff] }
  0x16   :  { %1205 = vmatmul.mubr.msk.f32.gmra.mxu0 %vm64_vm0, %v28_v15  ;;  %1253 = vmatprep.subr.mxu0 %v428_v18  ;;  %v37_v32 = vld [vmem:[%s2193_s0 + $0x80] sm:$0xff]  ;;  %v38_v33 = vld [vmem:[%s2193_s0 + $0x88] sm:$0xff]  ;;  %v39_v34 = vld [vmem:[%s2193_s0 + $0x90] sm:$0xff] }
  0x17   :  { %1207 = vmatprep.mubr.msk.f32.mxu0 %vm64_vm0, %v29_v17  ;;  %1254 = vmatpush3.msra.mxu0 %v428_v18  ;;  %v40_v35 = vld [vmem:[%s2193_s0 + $0x98] sm:$0xff]  ;;  %v41_v36 = vld [vmem:[%s2193_s0 + $0xa0] sm:$0xff]  ;;  %v42_v37 = vld [vmem:[%s2193_s0 + $0xa8] sm:$0xff] }
  0x18   :  { %1255 = vmatprep.subr.mxu0 %v427_v20  ;;  %1326 = vmatprep.subr.mxu1 %v430_v14  ;;  %v43_v38 = vld [vmem:[%s2193_s0 + $0xb0] sm:$0xff]  ;;  %v44_v39 = vld [vmem:[%s2193_s0 + $0xb8] sm:$0xff]  ;;  %v45_v40 = vld [vmem:[%s2193_s0 + $0xc0] sm:$0xff] }
  0x19   :  { %1256 = vmatpush3.msra.mxu0 %v427_v20  ;;  %1342 = vmatpush3.msra.mxu1 %v430_v14  ;;  %v46_v41 = vld [vmem:[%s2193_s0 + $0xc8] sm:$0xff]  ;;  %v47_v42 = vld [vmem:[%s2193_s0 + $0xd0] sm:$0xff]  ;;  %v48_v43 = vld [vmem:[%s2193_s0 + $0xd8] sm:$0xff] }
  0x1a   :  { %1208 = vmatmul.mubr.msk.f32.gmra.mxu0 %vm64_vm0, %v30_v19  ;;  %1257 = vmatprep.subr.mxu0 %v426_v22  ;;  %v49_v44 = vld [vmem:[%s2193_s0 + $0xe0] sm:$0xff]  ;;  %v50_v45 = vld [vmem:[%s2193_s0 + $0xe8] sm:$0xff]  ;;  %v51_v46 = vld [vmem:[%s2193_s0 + $0xf0] sm:$0xff] }
  0x1b   :  { %1210 = vmatprep.mubr.msk.f32.mxu0 %vm64_vm0, %v31_v21  ;;  %1258 = vmatpush3.msra.mxu0 %v426_v22  ;;  %v52_v47 = vld [vmem:[%s2193_s0 + $0xf8] sm:$0xff]  ;;  %v420_v49 = vld [vmem:[%s2196_s3 + $0x10] sm:$0xff]  ;;  %v419_v50 = vld [vmem:[%s2196_s3 + $0x8] sm:$0xff] }
  0x1c   :  { %1259 = vmatprep.subr.mxu0 %v425_v24  ;;  %1327 = vmatprep.subr.mxu1 %v429_v16  ;;  %v421_v48 = vld [vmem:[%s2196_s3 + $0x18] sm:$0xff]  ;;  %v418_v51 = vld [vmem:[%s2196_s3] sm:$0xff] }
  0x1d   :  { %1260 = vmatpush3.msra.mxu0 %v425_v24  ;;  %1343 = vmatpush3.msra.mxu1 %v429_v16  ;;  %v1796_v52 = vld [vmem:[%s2195_s2] ss:$0 sm:$0xff] }
  0x1e   :  { %1211 = vmatmul.mubr.msk.f32.gmra.mxu0 %vm64_vm0, %v32_v23  ;;  %1261 = vmatprep.subr.mxu0 %v424_v26 }
  0x1f   :  { %1213 = vmatprep.mubr.msk.f32.mxu0 %vm64_vm0, %v33_v25  ;;  %1262 = vmatpush3.msra.mxu0 %v424_v26 }
  0x20   :  { %1263 = vmatprep.subr.mxu0 %v423_v28  ;;  %1328 = vmatprep.subr.mxu1 %v428_v18 }
  0x21   :  { %1264 = vmatpush3.msra.mxu0 %v423_v28  ;;  %1344 = vmatpush3.msra.mxu1 %v428_v18 }
  0x22   :  { %1214 = vmatmul.mubr.msk.f32.gmra.mxu0 %vm64_vm0, %v34_v27  ;;  %1265 = vmatprep.subr.mxu0 %v422_v30 }
  0x23   :  { %1216 = vmatprep.mubr.msk.f32.mxu0 %vm64_vm0, %v35_v29  ;;  %1266 = vmatpush3.msra.mxu0 %v422_v30 }
  0x24   :  { %1329 = vmatprep.subr.mxu1 %v427_v20  ;;  %1267 = vmatprep.subr.mxu0 %v421_v48 }
  0x25   :  { %1345 = vmatpush3.msra.mxu1 %v427_v20  ;;  %1268 = vmatpush3.msra.mxu0 %v421_v48 }
  0x26   :  { %1217 = vmatmul.mubr.msk.f32.gmra.mxu0 %vm64_vm0, %v36_v31  ;;  %1330 = vmatprep.subr.mxu1 %v426_v22 }
  0x27   :  { %1219 = vmatprep.mubr.msk.f32.mxu0 %vm64_vm0, %v37_v32  ;;  %1346 = vmatpush3.msra.mxu1 %v426_v22 }
  0x28   :  { %1331 = vmatprep.subr.mxu1 %v425_v24  ;;  %1269 = vmatprep.subr.mxu0 %v420_v49 }
  0x29   :  { %1347 = vmatpush3.msra.mxu1 %v425_v24  ;;  %1270 = vmatpush3.msra.mxu0 %v420_v49 }
  0x2a   :  { %1220 = vmatmul.mubr.msk.f32.gmra.mxu0 %vm64_vm0, %v38_v33  ;;  %1332 = vmatprep.subr.mxu1 %v424_v26 }
  0x2b   :  { %1222 = vmatprep.mubr.msk.f32.mxu0 %vm64_vm0, %v39_v34  ;;  %1348 = vmatpush3.msra.mxu1 %v424_v26 }
  0x2c   :  { %1333 = vmatprep.subr.mxu1 %v423_v28  ;;  %1271 = vmatprep.subr.mxu0 %v419_v50 }
  0x2d   :  { %1349 = vmatpush3.msra.mxu1 %v423_v28  ;;  %1272 = vmatpush3.msra.mxu0 %v419_v50 }
  0x2e   :  { %1223 = vmatmul.mubr.msk.f32.gmra.mxu0 %vm64_vm0, %v40_v35  ;;  %1334 = vmatprep.subr.mxu1 %v422_v30 }
  0x2f   :  { %1225 = vmatprep.mubr.msk.f32.mxu0 %vm64_vm0, %v41_v36  ;;  %1350 = vmatpush3.msra.mxu1 %v422_v30 }
  0x30   :  { %1335 = vmatprep.subr.mxu1 %v421_v48  ;;  %1273 = vmatprep.subr.mxu0 %v418_v51 }
  0x31   :  { %1351 = vmatpush3.msra.mxu1 %v421_v48  ;;  %1274 = vmatpush3.msra.mxu0 %v418_v51 }
  0x32   :  { %1226 = vmatmul.mubr.msk.f32.gmra.mxu0 %vm64_vm0, %v42_v37  ;;  %1336 = vmatprep.subr.mxu1 %v420_v49 }
  0x33   :  { %1228 = vmatprep.mubr.msk.f32.mxu0 %vm64_vm0, %v43_v38  ;;  %1352 = vmatpush3.msra.mxu1 %v420_v49 }
  0x34   :  { %1337 = vmatprep.subr.mxu1 %v419_v50 }
  0x35   :  { %1353 = vmatpush3.msra.mxu1 %v419_v50 }
  0x36   :  { %1229 = vmatmul.mubr.msk.f32.gmra.mxu0 %vm64_vm0, %v44_v39  ;;  %1338 = vmatprep.subr.mxu1 %v418_v51 }
  0x37   :  { %1231 = vmatprep.mubr.msk.f32.mxu0 %vm64_vm0, %v45_v40  ;;  %1354 = vmatpush3.msra.mxu1 %v418_v51 }
  0x3a   :  { %1232 = vmatmul.mubr.msk.f32.gmra.mxu0 %vm64_vm0, %v46_v41 }
  0x3b   :  { %1234 = vmatprep.mubr.msk.f32.mxu0 %vm64_vm0, %v47_v42 }
  0x3e   :  { %1235 = vmatmul.mubr.msk.f32.gmra.mxu0 %vm64_vm0, %v48_v43 }
  0x3f   :  { %1237 = vmatprep.mubr.msk.f32.mxu0 %vm64_vm0, %v49_v44 }
  0x42   :  { %1238 = vmatmul.mubr.msk.f32.gmra.mxu0 %vm64_vm0, %v50_v45 }
  0x43   :  { %1240 = vmatprep.mubr.msk.f32.mxu0 %vm64_vm0, %v51_v46 }
  0x46   :  { %1241 = vmatmul.mubr.msk.f32.gmra.mxu0 %vm64_vm0, %v52_v47 }
  0xca   :  { %v1197_v53 = vpop.f32.mrf.mxu0 }
  0xcb   :  { %v233_v54 = vadd.f32 %v1197_v53, %v1796_v52 }
  0xcc   :  { %v227_v55 = vpop.f32.mrf.mxu0 }
  0xcd   :  { %v228_v56 = vadd.f32 %v1796_v52, %v227_v55 }
  0xce   :  { %v1200_v57 = vpop.f32.mrf.mxu0 }
  0xcf   :  { %1358 = vtanh.f32 %v228_v56  ;;  %v243_v58 = vadd.f32 %v1200_v57, %v1796_v52 }
  0xd0   :  { %1360 = vtanh.f32 %v233_v54  ;;  %v237_v59 = vpop.f32.mrf.mxu0 }
  0xd1   :  { %v238_v60 = vadd.f32 %v1796_v52, %v237_v59 }
  0xd2   :  { %v1203_v61 = vpop.f32.mrf.mxu0 }
  0xd3   :  { %1362 = vtanh.f32 %v238_v60  ;;  %v253_v62 = vadd.f32 %v1203_v61, %v1796_v52 }
  0xd4   :  { %1364 = vtanh.f32 %v243_v58  ;;  %v247_v63 = vpop.f32.mrf.mxu0 }
  0xd5   :  { %v248_v0 = vadd.f32 %v1796_v52, %v247_v63  ;;  %1366 = vtanh.f32 %v253_v62 }
  0xd6   :  { %v1206_v1 = vpop.f32.mrf.mxu0 }
  0xd7   :  { %1368 = vtanh.f32 %v248_v0  ;;  %v263_v2 = vadd.f32 %v1206_v1, %v1796_v52 }
  0xd8   :  { %v257_v3 = vpop.f32.mrf.mxu0 }
  0xd9   :  { %v258_v4 = vadd.f32 %v1796_v52, %v257_v3  ;;  %1370 = vtanh.f32 %v263_v2 }
  0xda   :  { %v1209_v5 = vpop.f32.mrf.mxu0 }
  0xdb   :  { %1372 = vtanh.f32 %v258_v4  ;;  %v273_v6 = vadd.f32 %v1209_v5, %v1796_v52 }
  0xdc   :  { %v1359_v7 = vpop.eup %1358  ;;  %v267_v8 = vpop.f32.mrf.mxu0 }
  0xdd   :  { %v1361_v9 = vpop.eup %1360  ;;  %v268_v10 = vadd.f32 %v1796_v52, %v267_v8  ;;  %1275 = vmatprep.mubr.f32.mxu0 %v1359_v7  ;;  %1374 = vtanh.f32 %v273_v6 }
  0xde   :  { %v1212_v11 = vpop.f32.mrf.mxu0  ;;  %1276 = vmatmul.mubr.f32.vlgmr.msra.gmra.mxu0 %v1361_v9 }
  0xdf   :  { %1376 = vtanh.f32 %v268_v10  ;;  %v283_v12 = vadd.f32 %v1212_v11, %v1796_v52 }
  0xe0   :  { %v1363_v13 = vpop.eup %1362  ;;  %v277_v14 = vpop.f32.mrf.mxu0 }
  0xe1   :  { %v1365_v15 = vpop.eup %1364  ;;  %v278_v16 = vadd.f32 %v1796_v52, %v277_v14  ;;  %1278 = vmatprep.mubr.f32.mxu0 %v1363_v13  ;;  %1378 = vtanh.f32 %v283_v12 }
  0xe2   :  { %v1215_v17 = vpop.f32.mrf.mxu0  ;;  %1279 = vmatmul.mubr.f32.gmra.mxu0 %v1365_v15  ;;  %v1367_v18 = vpop.eup %1366 }
  0xe3   :  { %1380 = vtanh.f32 %v278_v16  ;;  %v293_v19 = vadd.f32 %v1215_v17, %v1796_v52 }
  0xe4   :  { %v1369_v20 = vpop.eup %1368  ;;  %v287_v21 = vpop.f32.mrf.mxu0 }
  0xe5   :  { %v288_v22 = vadd.f32 %v1796_v52, %v287_v21  ;;  %1281 = vmatprep.mubr.f32.mxu0 %v1369_v20  ;;  %1382 = vtanh.f32 %v293_v19 }
  0xe6   :  { %v1218_v23 = vpop.f32.mrf.mxu0  ;;  %1282 = vmatmul.mubr.f32.gmra.mxu0 %v1367_v18  ;;  %v1371_v24 = vpop.eup %1370 }
  0xe7   :  { %1384 = vtanh.f32 %v288_v22  ;;  %v303_v25 = vadd.f32 %v1218_v23, %v1796_v52  ;;  %v1833_v22 = vld [vmem:[%s2197_s4] ss:$0 sm:$0xff]  ;;  %s1572_s4 = smov [#allocation2]  }
  0xe8   :  { %v1373_v26 = vpop.eup %1372  ;;  %v297_v27 = vpop.f32.mrf.mxu0  ;;  %s1058_s19 = sshll.u32 %s1572_s4, 4  ;;  %s1059_s19 = int_to_ptr.vmem [resolvable:$true] %s1058_s19 }
  0xe9   :  { %v298_v28 = vadd.f32 %v1796_v52, %v297_v27  ;;  %1284 = vmatprep.mubr.f32.mxu1 %v1373_v26  ;;  %1386 = vtanh.f32 %v303_v25  ;;  %s1550_s20 = scalar_lea.vmem %s1059_s19, 4096  ;;  %p1555_p1 = scmp.lt.s32.totalorder %s1059_s19, %s1059_s19 }
  0xea   :  { %v1221_v29 = vpop.f32.mrf.mxu0  ;;  %1285 = vmatmul.mubr.f32.vlgmr.msra.gmra.mxu1 %v1371_v24  ;;  %v1375_v30 = vpop.eup %1374  ;;  %p1551_p0 = scmp.ne.s32.totalorder %s1059_s19, %s1550_s20  ;;  %p1556_p2 = scmp.lt.s32.totalorder %s1550_s20, %s1550_s20 }
  0xeb   :  { %1388 = vtanh.f32 %v298_v28  ;;  %v313_v31 = vadd.f32 %v1221_v29, %v1796_v52 }
  0xec   :  { %v1377_v32 = vpop.eup %1376  ;;  %v307_v33 = vpop.f32.mrf.mxu0  ;;  %p1557_p3 = por %p1556_p2, %p1555_p1 }
  0xed   :  { %v308_v34 = vadd.f32 %v1796_v52, %v307_v33  ;;  %1287 = vmatprep.mubr.f32.mxu1 %v1377_v32  ;;  %1390 = vtanh.f32 %v313_v31 }
  0xee   :  { %v1224_v35 = vpop.f32.mrf.mxu0  ;;  %1288 = vmatmul.mubr.f32.gmra.mxu1 %v1375_v30  ;;  %v1379_v36 = vpop.eup %1378  ;;  %p1558_p4 = pnand %p1557_p3, %p1551_p0 }
  0xef   :  { %1392 = vtanh.f32 %v308_v34  ;;  %v323_v37 = vadd.f32 %v1224_v35, %v1796_v52 }
  0xf0   :  { %v1381_v38 = vpop.eup %1380  ;;  %v317_v39 = vpop.f32.mrf.mxu0 }
  0xf1   :  { %v318_v40 = vadd.f32 %v1796_v52, %v317_v39  ;;  %1290 = vmatprep.mubr.f32.mxu1 %v1381_v38  ;;  %1394 = vtanh.f32 %v323_v37 }
  0xf2   :  { %v1227_v41 = vpop.f32.mrf.mxu0  ;;  %1291 = vmatmul.mubr.f32.gmra.mxu1 %v1379_v36  ;;  %v1383_v42 = vpop.eup %1382 }
  0xf3   :  { %1396 = vtanh.f32 %v318_v40  ;;  %v333_v43 = vadd.f32 %v1227_v41, %v1796_v52 }
  0xf4   :  { %v1385_v44 = vpop.eup %1384  ;;  %v327_v45 = vpop.f32.mrf.mxu0 }
  0xf5   :  { %v328_v46 = vadd.f32 %v1796_v52, %v327_v45  ;;  %1293 = vmatprep.mubr.f32.mxu1 %v1385_v44  ;;  %1398 = vtanh.f32 %v333_v43 }
  0xf6   :  { %v1230_v47 = vpop.f32.mrf.mxu0  ;;  %1294 = vmatmul.mubr.f32.gmra.mxu1 %v1383_v42  ;;  %v1387_v48 = vpop.eup %1386 }
  0xf7   :  { %1400 = vtanh.f32 %v328_v46  ;;  %v343_v49 = vadd.f32 %v1230_v47, %v1796_v52 }
  0xf8   :  { %v1389_v50 = vpop.eup %1388  ;;  %v337_v51 = vpop.f32.mrf.mxu0 }
  0xf9   :  { %v338_v53 = vadd.f32 %v1796_v52, %v337_v51  ;;  %1296 = vmatprep.mubr.f32.mxu1 %v1389_v50  ;;  %1402 = vtanh.f32 %v343_v49 }
  0xfa   :  { %v1233_v54 = vpop.f32.mrf.mxu0  ;;  %1297 = vmatmul.mubr.f32.gmra.mxu1 %v1387_v48  ;;  %v1391_v55 = vpop.eup %1390 }
  0xfb   :  { %1404 = vtanh.f32 %v338_v53  ;;  %v353_v56 = vadd.f32 %v1233_v54, %v1796_v52 }
  0xfc   :  { %v1393_v57 = vpop.eup %1392  ;;  %v347_v58 = vpop.f32.mrf.mxu0 }
  0xfd   :  { %v348_v59 = vadd.f32 %v1796_v52, %v347_v58  ;;  %1299 = vmatprep.mubr.f32.mxu1 %v1393_v57  ;;  %1406 = vtanh.f32 %v353_v56 }
  0xfe   :  { %v1236_v60 = vpop.f32.mrf.mxu0  ;;  %1300 = vmatmul.mubr.f32.gmra.mxu1 %v1391_v55  ;;  %v1395_v61 = vpop.eup %1394 }
  0xff   :  { %1408 = vtanh.f32 %v348_v59  ;;  %v363_v62 = vadd.f32 %v1236_v60, %v1796_v52 }
 0x100   :  { %v1397_v63 = vpop.eup %1396  ;;  %v357_v0 = vpop.f32.mrf.mxu0 }
 0x101   :  { %v358_v1 = vadd.f32 %v1796_v52, %v357_v0  ;;  %1302 = vmatprep.mubr.f32.mxu1 %v1397_v63  ;;  %1410 = vtanh.f32 %v363_v62 }
 0x102   :  { %v1239_v2 = vpop.f32.mrf.mxu0  ;;  %1303 = vmatmul.mubr.f32.gmra.mxu1 %v1395_v61  ;;  %v1399_v3 = vpop.eup %1398 }
 0x103   :  { %1412 = vtanh.f32 %v358_v1  ;;  %v373_v4 = vadd.f32 %v1239_v2, %v1796_v52 }
 0x104   :  { %v1401_v5 = vpop.eup %1400  ;;  %v367_v6 = vpop.f32.mrf.mxu0 }
 0x105   :  { %v368_v7 = vadd.f32 %v1796_v52, %v367_v6  ;;  %1305 = vmatprep.mubr.f32.mxu1 %v1401_v5  ;;  %1414 = vtanh.f32 %v373_v4 }
 0x106   :  { %v1242_v8 = vpop.f32.mrf.mxu0  ;;  %1306 = vmatmul.mubr.f32.gmra.mxu1 %v1399_v3  ;;  %v1403_v9 = vpop.eup %1402 }
 0x107   :  { %1416 = vtanh.f32 %v368_v7  ;;  %v383_v10 = vadd.f32 %v1242_v8, %v1796_v52 }
 0x108   :  { %v1405_v11 = vpop.eup %1404  ;;  %v377_v12 = vpop.f32.mrf.mxu0 }
 0x109   :  { %v378_v13 = vadd.f32 %v1796_v52, %v377_v12  ;;  %1308 = vmatprep.mubr.f32.mxu1 %v1405_v11  ;;  %1418 = vtanh.f32 %v383_v10  ;;  %v698_v52 = vlaneseq }
 0x10a   :  { %1309 = vmatmul.mubr.f32.gmra.mxu1 %v1403_v9  ;;  %v1407_v14 = vpop.eup %1406 }
 0x10b   :  { %1420 = vtanh.f32 %v378_v13  ;;  %v1835_v23 = vand.u32 127, %v698_v52 }
 0x10c   :  { %v1409_v15 = vpop.eup %1408 }
 0x10d   :  { %1311 = vmatprep.mubr.f32.mxu1 %v1409_v15  ;;  %vm700_vm1 = vcmp.lt.s32.totalorder %v1835_v23, 16 }
 0x10e   :  { %1312 = vmatmul.mubr.f32.gmra.mxu1 %v1407_v14  ;;  %v1411_v16 = vpop.eup %1410 }
 0x110   :  { %v1413_v17 = vpop.eup %1412 }
 0x111   :  { %1314 = vmatprep.mubr.f32.mxu1 %v1413_v17 }
 0x112   :  { %1315 = vmatmul.mubr.f32.gmra.mxu1 %v1411_v16  ;;  %v1415_v18 = vpop.eup %1414 }
 0x114   :  { %v1417_v19 = vpop.eup %1416 }
 0x115   :  { %1317 = vmatprep.mubr.f32.mxu1 %v1417_v19 }
 0x116   :  { %1318 = vmatmul.mubr.f32.gmra.mxu1 %v1415_v18  ;;  %v1419_v20 = vpop.eup %1418 }
 0x118   :  { %v1421_v21 = vpop.eup %1420 }
 0x119   :  { %1320 = vmatprep.mubr.f32.mxu1 %v1421_v21 }
 0x11a   :  { %1321 = vmatmul.mubr.f32.gmra.mxu1 %v1419_v20 }
 0x19e   :  { %v1277_v24 = vpop.f32.mrf.mxu0 }
 0x19f   :  { %v513_v25 = vadd.f32 %v1277_v24, %v1833_v22 }
 0x1a0   :  { %v507_v26 = vpop.f32.mrf.mxu0 }
 0x1a1   :  { %v667_v27 = vmax.f32 %v513_v25, 0.0  ;;  %v508_v28 = vadd.f32 %v1833_v22, %v507_v26 }
 0x1a2   :  { %v1280_v29 = vpop.f32.mrf.mxu0 }
 0x1a3   :  { %v666_v30 = vmax.f32 %v508_v28, 0.0  ;;  %v523_v31 = vadd.f32 %v1280_v29, %v1833_v22  ;;  %v1843_v32 = vsel %vm700_vm1, %v667_v27, -1e+30 }
 0x1a4   :  { %735 = vmax.xlane.f32.xlu0 %v1843_v32  ;;  %v517_v33 = vpop.f32.mrf.mxu0 }
 0x1a5   :  { %v669_v34 = vmax.f32 %v523_v31, 0.0  ;;  %v518_v35 = vadd.f32 %v1833_v22, %v517_v33  ;;  %v1854_v40 = vsel %vm700_vm1, %v666_v30, -1e+30 }
 0x1a6   :  { %v1283_v36 = vpop.f32.mrf.mxu0 }
 0x1a7   :  { %v668_v37 = vmax.f32 %v518_v35, 0.0  ;;  %v533_v38 = vadd.f32 %v1283_v36, %v1833_v22  ;;  %v1850_v39 = vsel %vm700_vm1, %v669_v34, -1e+30 }
 0x1a8   :  { %739 = vmax.xlane.f32.xlu1 %v1850_v39  ;;  %v527_v41 = vpop.f32.mrf.mxu0  ;;  %733 = vmax.xlane.f32.xlu0 %v1854_v40 }
 0x1a9   :  { %v528_v42 = vadd.f32 %v1833_v22, %v527_v41  ;;  %v671_v44 = vmax.f32 %v533_v38, 0.0  ;;  %v1862_v47 = vsel %vm700_vm1, %v668_v37, -1e+30 }
 0x1aa   :  { %v1286_v43 = vpop.f32.mrf.mxu1 }
 0x1ab   :  { %v670_v45 = vmax.f32 %v528_v42, 0.0  ;;  %v543_v46 = vadd.f32 %v1286_v43, %v1833_v22  ;;  %v1874_v56 = vsel %vm700_vm1, %v671_v44, -1e+30 }
 0x1ac   :  { %v537_v48 = vpop.f32.mrf.mxu1  ;;  %737 = vmax.xlane.f32.xlu1 %v1862_v47 }
 0x1ad   :  { %v538_v49 = vadd.f32 %v1833_v22, %v537_v48  ;;  %v1868_v50 = vsel %vm700_vm1, %v670_v45, -1e+30  ;;  %v673_v53 = vmax.f32 %v543_v46, 0.0 }
 0x1ae   :  { %v1289_v51 = vpop.f32.mrf.mxu1  ;;  %741 = vmax.xlane.f32.xlu0 %v1868_v50 }
 0x1af   :  { %v672_v54 = vmax.f32 %v538_v49, 0.0  ;;  %v553_v55 = vadd.f32 %v1289_v51, %v1833_v22  ;;  %v1886_v0 = vsel %vm700_vm1, %v673_v53, -1e+30 }
 0x1b0   :  { %v547_v57 = vpop.f32.mrf.mxu1  ;;  %743 = vmax.xlane.f32.xlu1 %v1874_v56 }
 0x1b1   :  { %v548_v58 = vadd.f32 %v1833_v22, %v547_v57  ;;  %v1880_v59 = vsel %vm700_vm1, %v672_v54, -1e+30  ;;  %v675_v61 = vmax.f32 %v553_v55, 0.0 }
 0x1b2   :  { %v1292_v60 = vpop.f32.mrf.mxu1  ;;  %745 = vmax.xlane.f32.xlu0 %v1880_v59 }
 0x1b3   :  { %v674_v62 = vmax.f32 %v548_v58, 0.0  ;;  %v563_v63 = vadd.f32 %v1292_v60, %v1833_v22  ;;  %v1898_v8 = vsel %vm700_vm1, %v675_v61, -1e+30 }
 0x1b4   :  { %v557_v1 = vpop.f32.mrf.mxu1  ;;  %747 = vmax.xlane.f32.xlu1 %v1886_v0 }
 0x1b5   :  { %v558_v2 = vadd.f32 %v1833_v22, %v557_v1  ;;  %v1892_v3 = vsel %vm700_vm1, %v674_v62, -1e+30  ;;  %v677_v5 = vmax.f32 %v563_v63, 0.0 }
 0x1b6   :  { %v1295_v4 = vpop.f32.mrf.mxu1  ;;  %749 = vmax.xlane.f32.xlu0 %v1892_v3 }
 0x1b7   :  { %v676_v6 = vmax.f32 %v558_v2, 0.0  ;;  %v573_v7 = vadd.f32 %v1295_v4, %v1833_v22  ;;  %v1910_v16 = vsel %vm700_vm1, %v677_v5, -1e+30 }
 0x1b8   :  { %v567_v9 = vpop.f32.mrf.mxu1  ;;  %751 = vmax.xlane.f32.xlu1 %v1898_v8 }
 0x1b9   :  { %v568_v10 = vadd.f32 %v1833_v22, %v567_v9  ;;  %v1904_v11 = vsel %vm700_vm1, %v676_v6, -1e+30  ;;  %v679_v13 = vmax.f32 %v573_v7, 0.0 }
 0x1ba   :  { %v1298_v12 = vpop.f32.mrf.mxu1  ;;  %753 = vmax.xlane.f32.xlu0 %v1904_v11 }
 0x1bb   :  { %v678_v14 = vmax.f32 %v568_v10, 0.0  ;;  %v583_v15 = vadd.f32 %v1298_v12, %v1833_v22  ;;  %v1922_v25 = vsel %vm700_vm1, %v679_v13, -1e+30 }
 0x1bc   :  { %v577_v17 = vpop.f32.mrf.mxu1  ;;  %755 = vmax.xlane.f32.xlu1 %v1910_v16 }
 0x1bd   :  { %v578_v18 = vadd.f32 %v1833_v22, %v577_v17  ;;  %v1916_v19 = vsel %vm700_vm1, %v678_v14, -1e+30  ;;  %v681_v21 = vmax.f32 %v583_v15, 0.0 }
 0x1be   :  { %v1301_v20 = vpop.f32.mrf.mxu1  ;;  %757 = vmax.xlane.f32.xlu0 %v1916_v19 }
 0x1bf   :  { %v680_v52 = vmax.f32 %v578_v18, 0.0  ;;  %v593_v24 = vadd.f32 %v1301_v20, %v1833_v22  ;;  %v1934_v34 = vsel %vm700_vm1, %v681_v21, -1e+30 }
 0x1c0   :  { %v587_v26 = vpop.f32.mrf.mxu1  ;;  %759 = vmax.xlane.f32.xlu1 %v1922_v25 }
 0x1c1   :  { %v588_v27 = vadd.f32 %v1833_v22, %v587_v26  ;;  %v1928_v28 = vsel %vm700_vm1, %v680_v52, -1e+30  ;;  %v683_v30 = vmax.f32 %v593_v24, 0.0 }
 0x1c2   :  { %v1304_v29 = vpop.f32.mrf.mxu1  ;;  %761 = vmax.xlane.f32.xlu0 %v1928_v28 }
 0x1c3   :  { %v682_v31 = vmax.f32 %v588_v27, 0.0  ;;  %v603_v33 = vadd.f32 %v1304_v29, %v1833_v22  ;;  %v1946_v44 = vsel %vm700_vm1, %v683_v30, -1e+30 }
 0x1c4   :  { %v597_v35 = vpop.f32.mrf.mxu1  ;;  %763 = vmax.xlane.f32.xlu1 %v1934_v34 }
 0x1c5   :  { %v598_v36 = vadd.f32 %v1833_v22, %v597_v35  ;;  %v1940_v37 = vsel %vm700_vm1, %v682_v31, -1e+30  ;;  %v685_v41 = vmax.f32 %v603_v33, 0.0 }
 0x1c6   :  { %v1307_v38 = vpop.f32.mrf.mxu1  ;;  %765 = vmax.xlane.f32.xlu0 %v1940_v37 }
 0x1c7   :  { %v684_v42 = vmax.f32 %v598_v36, 0.0  ;;  %v613_v43 = vadd.f32 %v1307_v38, %v1833_v22  ;;  %v1958_v55 = vsel %vm700_vm1, %v685_v41, -1e+30 }
 0x1c8   :  { %v607_v45 = vpop.f32.mrf.mxu1  ;;  %767 = vmax.xlane.f32.xlu1 %v1946_v44 }
 0x1c9   :  { %v608_v46 = vadd.f32 %v1833_v22, %v607_v45  ;;  %v1952_v48 = vsel %vm700_vm1, %v684_v42, -1e+30  ;;  %v687_v51 = vmax.f32 %v613_v43, 0.0 }
 0x1ca   :  { %v1310_v49 = vpop.f32.mrf.mxu1  ;;  %769 = vmax.xlane.f32.xlu0 %v1952_v48 }
 0x1cb   :  { %v686_v53 = vmax.f32 %v608_v46, 0.0  ;;  %v623_v54 = vadd.f32 %v1310_v49, %v1833_v22  ;;  %v1970_v2 = vsel %vm700_vm1, %v687_v51, -1e+30 }
 0x1cc   :  { %v617_v57 = vpop.f32.mrf.mxu1  ;;  %771 = vmax.xlane.f32.xlu1 %v1958_v55 }
 0x1cd   :  { %v618_v58 = vadd.f32 %v1833_v22, %v617_v57  ;;  %v1964_v60 = vsel %vm700_vm1, %v686_v53, -1e+30  ;;  %v689_v62 = vmax.f32 %v623_v54, 0.0 }
 0x1ce   :  { %v1313_v61 = vpop.f32.mrf.mxu1  ;;  %773 = vmax.xlane.f32.xlu0 %v1964_v60 }
 0x1cf   :  { %v688_v63 = vmax.f32 %v618_v58, 0.0  ;;  %v633_v1 = vadd.f32 %v1313_v61, %v1833_v22  ;;  %v1982_v13 = vsel %vm700_vm1, %v689_v62, -1e+30 }
 0x1d0   :  { %v627_v4 = vpop.f32.mrf.mxu1  ;;  %775 = vmax.xlane.f32.xlu1 %v1970_v2 }
 0x1d1   :  { %v628_v5 = vadd.f32 %v1833_v22, %v627_v4  ;;  %v1976_v6 = vsel %vm700_vm1, %v688_v63, -1e+30  ;;  %v691_v9 = vmax.f32 %v633_v1, 0.0 }
 0x1d2   :  { %v1316_v7 = vpop.f32.mrf.mxu1  ;;  %777 = vmax.xlane.f32.xlu0 %v1976_v6 }
 0x1d3   :  { %v690_v10 = vmax.f32 %v628_v5, 0.0  ;;  %v643_v12 = vadd.f32 %v1316_v7, %v1833_v22  ;;  %v1994_v24 = vsel %vm700_vm1, %v691_v9, -1e+30 }
 0x1d4   :  { %v637_v14 = vpop.f32.mrf.mxu1  ;;  %779 = vmax.xlane.f32.xlu1 %v1982_v13 }
 0x1d5   :  { %v638_v15 = vadd.f32 %v1833_v22, %v637_v14  ;;  %v1988_v17 = vsel %vm700_vm1, %v690_v10, -1e+30  ;;  %v693_v20 = vmax.f32 %v643_v12, 0.0 }
 0x1d6   :  { %v1319_v18 = vpop.f32.mrf.mxu1  ;;  %781 = vmax.xlane.f32.xlu0 %v1988_v17 }
 0x1d7   :  { %v692_v21 = vmax.f32 %v638_v15, 0.0  ;;  %v653_v52 = vadd.f32 %v1319_v18, %v1833_v22  ;;  %v2006_v36 = vsel %vm700_vm1, %v693_v20, -1e+30 }
 0x1d8   :  { %v647_v26 = vpop.f32.mrf.mxu1  ;;  %783 = vmax.xlane.f32.xlu1 %v1994_v24 }
 0x1d9   :  { %v648_v27 = vadd.f32 %v1833_v22, %v647_v26  ;;  %v2000_v29 = vsel %vm700_vm1, %v692_v21, -1e+30  ;;  %v695_v31 = vmax.f32 %v653_v52, 0.0 }
 0x1da   :  { %v1322_v30 = vpop.f32.mrf.mxu1  ;;  %785 = vmax.xlane.f32.xlu0 %v2000_v29 }
 0x1db   :  { %v694_v33 = vmax.f32 %v648_v27, 0.0  ;;  %v663_v35 = vadd.f32 %v1322_v30, %v1833_v22  ;;  %v2017_v46 = vsel %vm700_vm1, %v695_v31, -1e+30 }
 0x1dc   :  { %v657_v38 = vpop.f32.mrf.mxu1  ;;  %787 = vmax.xlane.f32.xlu1 %v2006_v36 }
 0x1dd   :  { %v697_v41 = vmax.f32 %v663_v35, 0.0  ;;  %v658_v42 = vadd.f32 %v1833_v22, %v657_v38  ;;  %v2012_v43 = vsel %vm700_vm1, %v694_v33, -1e+30 }
 0x1de   :  { %789 = vmax.xlane.f32.xlu0 %v2012_v43 }
 0x1df   :  { %v696_v45 = vmax.f32 %v658_v42, 0.0  ;;  %v2021_v49 = vsel %vm700_vm1, %v697_v41, -1e+30 }
 0x1e0   :  { %791 = vmax.xlane.f32.xlu1 %v2017_v46 }
 0x1e1   :  { %v2026_v22 = vsel %vm700_vm1, %v696_v45, -1e+30 }
 0x1e2   :  { %793 = vmax.xlane.f32.xlu0 %v2026_v22 }
 0x1e4   :  { %795 = vmax.xlane.f32.xlu1 %v2021_v49 }
 0x22d   :  { %v736_v51 = vpop.xlane.xlu0 %735 }
 0x22e   :  { %v798_v53 = vsub.f32 %v1843_v32, %v736_v51 }
 0x230   :  { %v831_v54 = vmul.f32 1.442695, %v798_v53 }
 0x231   :  { %v740_v57 = vpop.xlane.xlu1 %739  ;;  %v734_v58 = vpop.xlane.xlu0 %733 }
 0x232   :  { %1422 = vpow2.f32 %v831_v54  ;;  %v800_v61 = vsub.f32 %v1850_v39, %v740_v57  ;;  %v797_v62 = vsub.f32 %v1854_v40, %v734_v58 }
 0x234   :  { %v835_v63 = vmul.f32 1.442695, %v800_v61  ;;  %v829_v1 = vmul.f32 1.442695, %v797_v62 }
 0x235   :  { %v738_v23 = vpop.xlane.xlu1 %737 }
 0x236   :  { %1424 = vpow2.f32 %v835_v63  ;;  %v799_v4 = vsub.f32 %v1862_v47, %v738_v23 }
 0x237   :  { %1426 = vpow2.f32 %v829_v1  ;;  %v742_v5 = vpop.xlane.xlu0 %741 }
 0x238   :  { %v833_v7 = vmul.f32 1.442695, %v799_v4  ;;  %v801_v9 = vsub.f32 %v1868_v50, %v742_v5 }
 0x239   :  { %v744_v32 = vpop.xlane.xlu1 %743 }
 0x23a   :  { %1428 = vpow2.f32 %v833_v7  ;;  %v802_v10 = vsub.f32 %v1874_v56, %v744_v32  ;;  %v837_v12 = vmul.f32 1.442695, %v801_v9 }
 0x23b   :  { %v746_v14 = vpop.xlane.xlu0 %745 }
 0x23c   :  { %v839_v39 = vmul.f32 1.442695, %v802_v10  ;;  %v803_v40 = vsub.f32 %v1880_v59, %v746_v14 }
 0x23d   :  { %v748_v15 = vpop.xlane.xlu1 %747 }
 0x23e   :  { %1430 = vpow2.f32 %v839_v39  ;;  %v804_v18 = vsub.f32 %v1886_v0, %v748_v15  ;;  %v841_v47 = vmul.f32 1.442695, %v803_v40 }
 0x23f   :  { %v2038_v20 = vpop.eup %1422  ;;  %1432 = vpow2.f32 %v837_v12  ;;  %v750_v21 = vpop.xlane.xlu0 %749 }
 0x240   :  { %v843_v52 = vmul.f32 1.442695, %v804_v18  ;;  %v805_v50 = vsub.f32 %v1892_v3, %v750_v21  ;;  %895 = vadd.xlane.f32.xlu1 %v2038_v20 }
 0x241   :  { %v752_v56 = vpop.xlane.xlu1 %751 }
 0x242   :  { %1434 = vpow2.f32 %v843_v52  ;;  %v806_v26 = vsub.f32 %v1898_v8, %v752_v56  ;;  %v845_v59 = vmul.f32 1.442695, %v805_v50 }
 0x243   :  { %v2043_v27 = vpop.eup %1424  ;;  %1436 = vpow2.f32 %v841_v47  ;;  %v754_v30 = vpop.xlane.xlu0 %753 }
 0x244   :  { %v2045_v0 = vpop.eup %1426  ;;  %v847_v31 = vmul.f32 1.442695, %v806_v26  ;;  %v807_v33 = vsub.f32 %v1904_v11, %v754_v30  ;;  %899 = vadd.xlane.f32.xlu1 %v2043_v27 }
 0x245   :  { %893 = vadd.xlane.f32.xlu0 %v2045_v0  ;;  %v756_v3 = vpop.xlane.xlu1 %755 }
 0x246   :  { %1438 = vpow2.f32 %v847_v31  ;;  %v808_v35 = vsub.f32 %v1910_v16, %v756_v3  ;;  %v849_v8 = vmul.f32 1.442695, %v807_v33 }
 0x247   :  { %v2051_v38 = vpop.eup %1428  ;;  %1440 = vpow2.f32 %v845_v59  ;;  %v758_v41 = vpop.xlane.xlu0 %757 }
 0x248   :  { %v851_v42 = vmul.f32 1.442695, %v808_v35  ;;  %v809_v45 = vsub.f32 %v1916_v19, %v758_v41 }
 0x249   :  { %897 = vadd.xlane.f32.xlu0 %v2051_v38  ;;  %v760_v51 = vpop.xlane.xlu1 %759 }
 0x24a   :  { %1442 = vpow2.f32 %v851_v42  ;;  %v810_v11 = vsub.f32 %v1922_v25, %v760_v51  ;;  %v853_v54 = vmul.f32 1.442695, %v809_v45 }
 0x24b   :  { %v2056_v53 = vpop.eup %1430  ;;  %1444 = vpow2.f32 %v849_v8  ;;  %v762_v57 = vpop.xlane.xlu0 %761 }
 0x24c   :  { %v2058_v16 = vpop.eup %1432  ;;  %v855_v58 = vmul.f32 1.442695, %v810_v11  ;;  %v811_v61 = vsub.f32 %v1928_v28, %v762_v57  ;;  %903 = vadd.xlane.f32.xlu1 %v2056_v53 }
 0x24d   :  { %901 = vadd.xlane.f32.xlu0 %v2058_v16  ;;  %v764_v19 = vpop.xlane.xlu1 %763 }
 0x24e   :  { %1446 = vpow2.f32 %v855_v58  ;;  %v812_v62 = vsub.f32 %v1934_v34, %v764_v19  ;;  %v857_v25 = vmul.f32 1.442695, %v811_v61 }
 0x24f   :  { %v2064_v63 = vpop.eup %1434  ;;  %1448 = vpow2.f32 %v853_v54  ;;  %v766_v1 = vpop.xlane.xlu0 %765 }
 0x250   :  { %v2066_v23 = vpop.eup %1436  ;;  %v859_v4 = vmul.f32 1.442695, %v812_v62  ;;  %v813_v5 = vsub.f32 %v1940_v37, %v766_v1  ;;  %907 = vadd.xlane.f32.xlu1 %v2064_v63 }
 0x251   :  { %905 = vadd.xlane.f32.xlu0 %v2066_v23  ;;  %v768_v28 = vpop.xlane.xlu1 %767 }
 0x252   :  { %1450 = vpow2.f32 %v859_v4  ;;  %v814_v7 = vsub.f32 %v1946_v44, %v768_v28  ;;  %v861_v34 = vmul.f32 1.442695, %v813_v5 }
 0x253   :  { %v2072_v9 = vpop.eup %1438  ;;  %1452 = vpow2.f32 %v857_v25  ;;  %v770_v32 = vpop.xlane.xlu0 %769 }
 0x254   :  { %v2074_v10 = vpop.eup %1440  ;;  %v863_v12 = vmul.f32 1.442695, %v814_v7  ;;  %v815_v14 = vsub.f32 %v1952_v48, %v770_v32  ;;  %911 = vadd.xlane.f32.xlu1 %v2072_v9 }
 0x255   :  { %909 = vadd.xlane.f32.xlu0 %v2074_v10  ;;  %v772_v37 = vpop.xlane.xlu1 %771 }
 0x256   :  { %1454 = vpow2.f32 %v863_v12  ;;  %v816_v39 = vsub.f32 %v1958_v55, %v772_v37  ;;  %v865_v44 = vmul.f32 1.442695, %v815_v14 }
 0x257   :  { %v2080_v40 = vpop.eup %1442  ;;  %1456 = vpow2.f32 %v861_v34  ;;  %v774_v15 = vpop.xlane.xlu0 %773 }
 0x258   :  { %v2082_v18 = vpop.eup %1444  ;;  %v867_v47 = vmul.f32 1.442695, %v816_v39  ;;  %v817_v21 = vsub.f32 %v1964_v60, %v774_v15  ;;  %915 = vadd.xlane.f32.xlu1 %v2080_v40 }
 0x259   :  { %913 = vadd.xlane.f32.xlu0 %v2082_v18  ;;  %v776_v48 = vpop.xlane.xlu1 %775 }
 0x25a   :  { %1458 = vpow2.f32 %v867_v47  ;;  %v818_v52 = vsub.f32 %v1970_v2, %v776_v48  ;;  %v869_v55 = vmul.f32 1.442695, %v817_v21 }
 0x25b   :  { %v2088_v50 = vpop.eup %1446  ;;  %1460 = vpow2.f32 %v865_v44  ;;  %v778_v56 = vpop.xlane.xlu0 %777 }
 0x25c   :  { %v2090_v26 = vpop.eup %1448  ;;  %v871_v59 = vmul.f32 1.442695, %v818_v52  ;;  %v819_v30 = vsub.f32 %v1976_v6, %v778_v56  ;;  %919 = vadd.xlane.f32.xlu1 %v2088_v50 }
 0x25d   :  { %917 = vadd.xlane.f32.xlu0 %v2090_v26  ;;  %v780_v60 = vpop.xlane.xlu1 %779 }
 0x25e   :  { %1462 = vpow2.f32 %v871_v59  ;;  %v820_v31 = vsub.f32 %v1982_v13, %v780_v60  ;;  %v873_v2 = vmul.f32 1.442695, %v819_v30 }
 0x25f   :  { %v2096_v33 = vpop.eup %1450  ;;  %1464 = vpow2.f32 %v869_v55  ;;  %v782_v3 = vpop.xlane.xlu0 %781 }
 0x260   :  { %v2098_v35 = vpop.eup %1452  ;;  %v875_v8 = vmul.f32 1.442695, %v820_v31  ;;  %v821_v41 = vsub.f32 %v1988_v17, %v782_v3  ;;  %923 = vadd.xlane.f32.xlu1 %v2096_v33 }
 0x261   :  { %921 = vadd.xlane.f32.xlu0 %v2098_v35  ;;  %v784_v6 = vpop.xlane.xlu1 %783 }
 0x262   :  { %1466 = vpow2.f32 %v875_v8  ;;  %v822_v42 = vsub.f32 %v1994_v24, %v784_v6  ;;  %v877_v13 = vmul.f32 1.442695, %v821_v41 }
 0x263   :  { %v2104_v45 = vpop.eup %1454  ;;  %1468 = vpow2.f32 %v873_v2  ;;  %v786_v51 = vpop.xlane.xlu0 %785 }
 0x264   :  { %v2106_v11 = vpop.eup %1456  ;;  %v879_v54 = vmul.f32 1.442695, %v822_v42  ;;  %v823_v57 = vsub.f32 %v2000_v29, %v786_v51  ;;  %927 = vadd.xlane.f32.xlu1 %v2104_v45 }
 0x265   :  { %925 = vadd.xlane.f32.xlu0 %v2106_v11  ;;  %v788_v17 = vpop.xlane.xlu1 %787 }
 0x266   :  { %1470 = vpow2.f32 %v879_v54  ;;  %v824_v58 = vsub.f32 %v2006_v36, %v788_v17  ;;  %v881_v24 = vmul.f32 1.442695, %v823_v57 }
 0x267   :  { %v2112_v61 = vpop.eup %1458  ;;  %1472 = vpow2.f32 %v877_v13  ;;  %v790_v19 = vpop.xlane.xlu0 %789 }
 0x268   :  { %v2114_v62 = vpop.eup %1460  ;;  %v883_v25 = vmul.f32 1.442695, %v824_v58  ;;  %v825_v1 = vsub.f32 %v2012_v43, %v790_v19  ;;  %931 = vadd.xlane.f32.xlu1 %v2112_v61 }
 0x269   :  { %929 = vadd.xlane.f32.xlu0 %v2114_v62  ;;  %v792_v29 = vpop.xlane.xlu1 %791 }
 0x26a   :  { %1474 = vpow2.f32 %v883_v25  ;;  %v826_v4 = vsub.f32 %v2017_v46, %v792_v29  ;;  %v885_v36 = vmul.f32 1.442695, %v825_v1 }
 0x26b   :  { %v2120_v5 = vpop.eup %1462  ;;  %1476 = vpow2.f32 %v881_v24  ;;  %v794_v28 = vpop.xlane.xlu0 %793 }
 0x26c   :  { %v2122_v7 = vpop.eup %1464  ;;  %v887_v34 = vmul.f32 1.442695, %v826_v4  ;;  %v827_v32 = vsub.f32 %v2026_v22, %v794_v28  ;;  %935 = vadd.xlane.f32.xlu1 %v2120_v5 }
 0x26d   :  { %933 = vadd.xlane.f32.xlu0 %v2122_v7  ;;  %v796_v43 = vpop.xlane.xlu1 %795 }
 0x26e   :  { %1478 = vpow2.f32 %v887_v34  ;;  %v828_v12 = vsub.f32 %v2021_v49, %v796_v43  ;;  %v889_v46 = vmul.f32 1.442695, %v827_v32 }
 0x26f   :  { %v2128_v14 = vpop.eup %1466  ;;  %1480 = vpow2.f32 %v885_v36 }
 0x270   :  { %v2130_v37 = vpop.eup %1468  ;;  %v891_v39 = vmul.f32 1.442695, %v828_v12  ;;  %939 = vadd.xlane.f32.xlu1 %v2128_v14 }
 0x271   :  { %937 = vadd.xlane.f32.xlu0 %v2130_v37 }
 0x272   :  { %1482 = vpow2.f32 %v891_v39 }
 0x273   :  { %v2134_v22 = vpop.eup %1470  ;;  %1484 = vpow2.f32 %v889_v46 }
 0x274   :  { %v2136_v44 = vpop.eup %1472  ;;  %943 = vadd.xlane.f32.xlu1 %v2134_v22 }
 0x275   :  { %941 = vadd.xlane.f32.xlu0 %v2136_v44 }
 0x277   :  { %v2140_v49 = vpop.eup %1474 }
 0x278   :  { %v2142_v15 = vpop.eup %1476  ;;  %947 = vadd.xlane.f32.xlu1 %v2140_v49 }
 0x279   :  { %945 = vadd.xlane.f32.xlu0 %v2142_v15 }
 0x27b   :  { %v2146_v47 = vpop.eup %1478 }
 0x27c   :  { %v2148_v21 = vpop.eup %1480  ;;  %951 = vadd.xlane.f32.xlu1 %v2146_v47 }
 0x27d   :  { %949 = vadd.xlane.f32.xlu0 %v2148_v21 }
 0x27f   :  { %v2152_v48 = vpop.eup %1482 }
 0x280   :  { %v2154_v52 = vpop.eup %1484  ;;  %955 = vadd.xlane.f32.xlu1 %v2152_v48 }
 0x281   :  { %953 = vadd.xlane.f32.xlu0 %v2154_v52 }
 0x2c9   :  { %v896_v55 = vpop.xlane.xlu1 %895 }
 0x2ca   :  { %1486 = vrcp.f32 %v896_v55 }
 0x2cd   :  { %v900_v56 = vpop.xlane.xlu1 %899 }
 0x2ce   :  { %1488 = vrcp.f32 %v900_v56  ;;  %v894_v59 = vpop.xlane.xlu0 %893 }
 0x2cf   :  { %1490 = vrcp.f32 %v894_v59 }
 0x2d2   :  { %v898_v30 = vpop.xlane.xlu0 %897 }
 0x2d3   :  { %1492 = vrcp.f32 %v898_v30 }
 0x2d5   :  { %v904_v60 = vpop.xlane.xlu1 %903 }
 0x2d6   :  { %1494 = vrcp.f32 %v904_v60  ;;  %v902_v31 = vpop.xlane.xlu0 %901 }
 0x2d7   :  { %v1487_v2 = vpop.eup %1486  ;;  %1496 = vrcp.f32 %v902_v31 }
 0x2d8   :  { %v960_v3 = vmul.f32 %v1487_v2, %v2038_v20 }
 0x2d9   :  { %v908_v8 = vpop.xlane.xlu1 %907 }
 0x2da   :  { %1022 = vst [vmem:[#allocation2 + $0x8] sm:$0xff] %v960_v3  ;;  %1498 = vrcp.f32 %v908_v8  ;;  %v906_v41 = vpop.xlane.xlu0 %905 }
 0x2db   :  { %v1489_v6 = vpop.eup %1488  ;;  %1500 = vrcp.f32 %v906_v41 }
 0x2dc   :  { %v1491_v42 = vpop.eup %1490  ;;  %v964_v13 = vmul.f32 %v1489_v6, %v2043_v27 }
 0x2dd   :  { %v958_v51 = vmul.f32 %v1491_v42, %v2045_v0  ;;  %v912_v54 = vpop.xlane.xlu1 %911 }
 0x2de   :  { %1024 = vst [vmem:[#allocation2 + $0x18] sm:$0xff] %v964_v13  ;;  %1502 = vrcp.f32 %v912_v54  ;;  %v910_v57 = vpop.xlane.xlu0 %909 }
 0x2df   :  { %1021 = vst [vmem:[#allocation2] sm:$0xff] %v958_v51  ;;  %1504 = vrcp.f32 %v910_v57 }
 0x2e0   :  { %v1493_v17 = vpop.eup %1492 }
 0x2e1   :  { %v962_v20 = vmul.f32 %v1493_v17, %v2051_v38  ;;  %v916_v58 = vpop.xlane.xlu1 %915 }
 0x2e2   :  { %1506 = vrcp.f32 %v916_v58  ;;  %v914_v24 = vpop.xlane.xlu0 %913 }
 0x2e3   :  { %v1495_v19 = vpop.eup %1494  ;;  %1023 = vst [vmem:[#allocation2 + $0x10] sm:$0xff] %v962_v20  ;;  %1508 = vrcp.f32 %v914_v24 }
 0x2e4   :  { %v1497_v25 = vpop.eup %1496  ;;  %v968_v27 = vmul.f32 %v1495_v19, %v2056_v53 }
 0x2e5   :  { %v966_v0 = vmul.f32 %v1497_v25, %v2058_v16  ;;  %v920_v1 = vpop.xlane.xlu1 %919 }
 0x2e6   :  { %1026 = vst [vmem:[#allocation2 + $0x28] sm:$0xff] %v968_v27  ;;  %1510 = vrcp.f32 %v920_v1  ;;  %v918_v29 = vpop.xlane.xlu0 %917 }
 0x2e7   :  { %v1499_v4 = vpop.eup %1498  ;;  %1025 = vst [vmem:[#allocation2 + $0x20] sm:$0xff] %v966_v0  ;;  %1512 = vrcp.f32 %v918_v29 }
 0x2e8   :  { %v1501_v36 = vpop.eup %1500  ;;  %v972_v38 = vmul.f32 %v1499_v4, %v2064_v63 }
 0x2e9   :  { %v970_v28 = vmul.f32 %v1501_v36, %v2066_v23  ;;  %v924_v34 = vpop.xlane.xlu1 %923 }
 0x2ea   :  { %1028 = vst [vmem:[#allocation2 + $0x38] sm:$0xff] %v972_v38  ;;  %1514 = vrcp.f32 %v924_v34  ;;  %v922_v32 = vpop.xlane.xlu0 %921 }
 0x2eb   :  { %v1503_v43 = vpop.eup %1502  ;;  %1027 = vst [vmem:[#allocation2 + $0x30] sm:$0xff] %v970_v28  ;;  %1516 = vrcp.f32 %v922_v32 }
 0x2ec   :  { %v1505_v53 = vpop.eup %1504  ;;  %v976_v16 = vmul.f32 %v1503_v43, %v2072_v9 }
 0x2ed   :  { %v974_v12 = vmul.f32 %v1505_v53, %v2074_v10  ;;  %v928_v46 = vpop.xlane.xlu1 %927 }
 0x2ee   :  { %1030 = vst [vmem:[#allocation2 + $0x48] sm:$0xff] %v976_v16  ;;  %1518 = vrcp.f32 %v928_v46  ;;  %v926_v39 = vpop.xlane.xlu0 %925 }
 0x2ef   :  { %v1507_v55 = vpop.eup %1506  ;;  %1029 = vst [vmem:[#allocation2 + $0x40] sm:$0xff] %v974_v12  ;;  %1520 = vrcp.f32 %v926_v39 }
 0x2f0   :  { %v1509_v63 = vpop.eup %1508  ;;  %v980_v23 = vmul.f32 %v1507_v55, %v2080_v40 }
 0x2f1   :  { %v978_v56 = vmul.f32 %v1509_v63, %v2082_v18  ;;  %v932_v59 = vpop.xlane.xlu1 %931 }
 0x2f2   :  { %1032 = vst [vmem:[#allocation2 + $0x58] sm:$0xff] %v980_v23  ;;  %1522 = vrcp.f32 %v932_v59  ;;  %v930_v30 = vpop.xlane.xlu0 %929 }
 0x2f3   :  { %v1511_v60 = vpop.eup %1510  ;;  %1031 = vst [vmem:[#allocation2 + $0x50] sm:$0xff] %v978_v56  ;;  %1524 = vrcp.f32 %v930_v30 }
 0x2f4   :  { %v1513_v9 = vpop.eup %1512  ;;  %v984_v10 = vmul.f32 %v1511_v60, %v2088_v50 }
 0x2f5   :  { %v982_v31 = vmul.f32 %v1513_v9, %v2090_v26  ;;  %v936_v2 = vpop.xlane.xlu1 %935 }
 0x2f6   :  { %1034 = vst [vmem:[#allocation2 + $0x68] sm:$0xff] %v984_v10  ;;  %1526 = vrcp.f32 %v936_v2  ;;  %v934_v3 = vpop.xlane.xlu0 %933 }
 0x2f7   :  { %v1515_v8 = vpop.eup %1514  ;;  %1033 = vst [vmem:[#allocation2 + $0x60] sm:$0xff] %v982_v31  ;;  %1528 = vrcp.f32 %v934_v3 }
 0x2f8   :  { %v1517_v40 = vpop.eup %1516  ;;  %v988_v18 = vmul.f32 %v1515_v8, %v2096_v33 }
 0x2f9   :  { %v986_v41 = vmul.f32 %v1517_v40, %v2098_v35  ;;  %v940_v6 = vpop.xlane.xlu1 %939 }
 0x2fa   :  { %1036 = vst [vmem:[#allocation2 + $0x78] sm:$0xff] %v988_v18  ;;  %1530 = vrcp.f32 %v940_v6  ;;  %v938_v42 = vpop.xlane.xlu0 %937 }
 0x2fb   :  { %v1519_v13 = vpop.eup %1518  ;;  %1035 = vst [vmem:[#allocation2 + $0x70] sm:$0xff] %v986_v41  ;;  %1532 = vrcp.f32 %v938_v42 }
 0x2fc   :  { %v1521_v50 = vpop.eup %1520  ;;  %v992_v26 = vmul.f32 %v1519_v13, %v2104_v45 }
 0x2fd   :  { %v990_v51 = vmul.f32 %v1521_v50, %v2106_v11  ;;  %v944_v54 = vpop.xlane.xlu1 %943 }
 0x2fe   :  { %1038 = vst [vmem:[#allocation2 + $0x88] sm:$0xff] %v992_v26  ;;  %1534 = vrcp.f32 %v944_v54  ;;  %v942_v57 = vpop.xlane.xlu0 %941 }
 0x2ff   :  { %v1523_v17 = vpop.eup %1522  ;;  %1037 = vst [vmem:[#allocation2 + $0x80] sm:$0xff] %v990_v51  ;;  %1536 = vrcp.f32 %v942_v57 }
 0x300   :  { %v1525_v33 = vpop.eup %1524  ;;  %v996_v35 = vmul.f32 %v1523_v17, %v2112_v61 }
 0x301   :  { %v994_v20 = vmul.f32 %v1525_v33, %v2114_v62  ;;  %v948_v58 = vpop.xlane.xlu1 %947 }
 0x302   :  { %1040 = vst [vmem:[#allocation2 + $0x98] sm:$0xff] %v996_v35  ;;  %1538 = vrcp.f32 %v948_v58  ;;  %v946_v24 = vpop.xlane.xlu0 %945 }
 0x303   :  { %v1527_v19 = vpop.eup %1526  ;;  %1039 = vst [vmem:[#allocation2 + $0x90] sm:$0xff] %v994_v20  ;;  %1540 = vrcp.f32 %v946_v24 }
 0x304   :  { %v1529_v45 = vpop.eup %1528  ;;  %v1000_v11 = vmul.f32 %v1527_v19, %v2120_v5 }
 0x305   :  { %v998_v25 = vmul.f32 %v1529_v45, %v2122_v7  ;;  %v952_v27 = vpop.xlane.xlu1 %951 }
 0x306   :  { %1042 = vst [vmem:[#allocation2 + $0xa8] sm:$0xff] %v1000_v11  ;;  %1542 = vrcp.f32 %v952_v27  ;;  %v950_v0 = vpop.xlane.xlu0 %949 }
 0x307   :  { %v1531_v1 = vpop.eup %1530  ;;  %1041 = vst [vmem:[#allocation2 + $0xa0] sm:$0xff] %v998_v25  ;;  %1544 = vrcp.f32 %v950_v0 }
 0x308   :  { %v1533_v61 = vpop.eup %1532  ;;  %v1004_v62 = vmul.f32 %v1531_v1, %v2128_v14 }
 0x309   :  { %v1002_v29 = vmul.f32 %v1533_v61, %v2130_v37  ;;  %v956_v4 = vpop.xlane.xlu1 %955 }
 0x30a   :  { %1044 = vst [vmem:[#allocation2 + $0xb8] sm:$0xff] %v1004_v62  ;;  %1546 = vrcp.f32 %v956_v4  ;;  %v954_v36 = vpop.xlane.xlu0 %953 }
 0x30b   :  { %v1535_v38 = vpop.eup %1534  ;;  %1043 = vst [vmem:[#allocation2 + $0xb0] sm:$0xff] %v1002_v29  ;;  %1548 = vrcp.f32 %v954_v36 }
 0x30c   :  { %v1537_v5 = vpop.eup %1536  ;;  %v1008_v7 = vmul.f32 %v1535_v38, %v2134_v22 }
 0x30d   :  { %v1006_v28 = vmul.f32 %v1537_v5, %v2136_v44 }
 0x30e   :  { %1046 = vst [vmem:[#allocation2 + $0xc8] sm:$0xff] %v1008_v7 }
 0x30f   :  { %v1539_v34 = vpop.eup %1538  ;;  %1045 = vst [vmem:[#allocation2 + $0xc0] sm:$0xff] %v1006_v28 }
 0x310   :  { %v1541_v32 = vpop.eup %1540  ;;  %v1012_v14 = vmul.f32 %v1539_v34, %v2140_v49 }
 0x311   :  { %v1010_v37 = vmul.f32 %v1541_v32, %v2142_v15 }
 0x312   :  { %1048 = vst [vmem:[#allocation2 + $0xd8] sm:$0xff] %v1012_v14 }
 0x313   :  { %v1543_v43 = vpop.eup %1542  ;;  %1047 = vst [vmem:[#allocation2 + $0xd0] sm:$0xff] %v1010_v37 }
 0x314   :  { %v1545_v53 = vpop.eup %1544  ;;  %v1016_v16 = vmul.f32 %v1543_v43, %v2146_v47 }
 0x315   :  { %v1014_v12 = vmul.f32 %v1545_v53, %v2148_v21 }
 0x316   :  { %1050 = vst [vmem:[#allocation2 + $0xe8] sm:$0xff] %v1016_v16 }
 0x317   :  { %v1547_v22 = vpop.eup %1546  ;;  %1049 = vst [vmem:[#allocation2 + $0xe0] sm:$0xff] %v1014_v12 }
 0x318   :  { %v1549_v44 = vpop.eup %1548  ;;  %v1020_v46 = vmul.f32 %v1547_v22, %v2152_v48 }
 0x319   :  { %v1018_v49 = vmul.f32 %v1549_v44, %v2154_v52 }
 0x31a   :  { %1052 = vst [vmem:[#allocation2 + $0xf8] sm:$0xff] %v1020_v46 }
 0x31b   :  { %1051 = vst [vmem:[#allocation2 + $0xf0] sm:$0xff] %v1018_v49 }
 0x31c   :  { %1561 = shalt.err (!%p1558_p4)
}
 0x31d   :  { %s1573_s21 = smov 128   ;;  %s1574_s22 = smov 8  }
 0x31e   :  { %1064 = dma.vmem_to_hbm [thread:$0]  %s1059_s19, 4096, %s2198_s5, [#allocation3], %s1573_s21, %s1573_s21, %s1574_s22  }
 0x31f   :  { %1570 = dma.done.wait [#allocation3], 4096  }
 0x320   :  { %1571 = vsyncadd [#allocation3], 4294963200 }
 0x321   :  { %1068 = vsyncpa [#allocation3], 1 }

</bundles_post_ra>
